<compile_context>
chip_gen: v7x
topology: tpu7x:2x2x1
jax: 0.10.0
libtpu: 0.0.40
codegen_flags: <defaults>
</compile_context>

<pallas_src>
import math
import numpy as np
import jax
import jax.numpy as jnp
from jax import lax
from jax.experimental import pallas as pl
from jax.experimental.pallas import tpu as pltpu

LOG2 = math.log(2.0)


def _softplus(x):
    # numerically stable softplus, matches F.softplus (used by the reference)
    return jnp.maximum(x, 0.0) + jnp.log1p(jnp.exp(-jnp.abs(x)))


def _mi_jsd_kernel(glob_ref, loc_ref, rid_ref, ep_ref, eq_ref):
    """One grid step = one (TM, D) row tile of ONE view's token embeddings.

    glob_ref : (B, D)   this view's sentence embeddings (VMEM-resident per view)
    loc_ref  : (TM, D)  row tile of this view's tokens (native B*S layout, padded)
    rid_ref  : (1, TM)  int32 sentence index of each row, -1 = padding / past length
    ep_ref   : (B, FW)  f32 accumulator of JSD positive-expectation elements
    eq_ref   : (B, FW)  f32 accumulator of JSD negative-expectation elements

    Output blocks keep the same block index across the inner ('arbitrary') grid
    axis, so they stay VMEM-resident and act as accumulators (init at i == 0).
    """
    i = pl.program_id(1)

    @pl.when(i == 0)
    def _():
        ep_ref[...] = jnp.zeros_like(ep_ref)
        eq_ref[...] = jnp.zeros_like(eq_ref)

    # res: (B, TM) = (B, D) . (TM, D)^T -- large N dim on lanes, f32 MXU accumulate.
    # TODO(synk): check the Mosaic dump for a per-step vxpose of the (TM, D) tile;
    # if present, store the tokens as (D, N) in HBM and block them as (D, TM).
    res = lax.dot_general(
        glob_ref[...], loc_ref[...],
        dimension_numbers=(((1,), (1,)), ((), ())),
        preferred_element_type=jnp.float32)

    rid = rid_ref[...]                                        # (1, TM) int32
    col = lax.broadcasted_iota(jnp.int32, res.shape, 0)       # (B, TM)
    pos = col == rid                                          # row's own sentence
    neg = (rid >= 0) & jnp.logical_not(pos)                   # valid row, other sent.

    # Single softplus: sp = softplus(-res). On real rows pos+neg == 1, so the JSD
    # E_pos element is -sp on pos and the E_neg element is sp+res on neg (the
    # +/- log2 terms of the reference cancel exactly); padded rows contribute 0.
    sp = jnp.maximum(-res, 0.0) + jnp.log1p(jnp.exp(-jnp.abs(res)))
    ep_c = jnp.where(pos, -sp, 0.0)                           # (B, TM)
    eq_c = jnp.where(neg, sp + res, 0.0)                      # (B, TM)

    # Fold the TM lane axis down to FW lanes with lane-aligned static slices
    # (pure VALU adds), so the resident accumulators / writeback are only (B, FW).
    tm = res.shape[1]
    fw = ep_ref.shape[-1]
    ep_f = ep_c[:, 0:fw]
    eq_f = eq_c[:, 0:fw]
    for k in range(1, tm // fw):
        ep_f = ep_f + ep_c[:, k * fw:(k + 1) * fw]
        eq_f = eq_f + eq_c[:, k * fw:(k + 1) * fw]
    ep_ref[...] += ep_f
    eq_ref[...] += eq_f


def _choose_tile(n_rows, d, itemsize, tile_rows=None, target_bytes=3 << 20,
                 max_rows=4096):
    """Pick (tm, n_pad, fold_width) for the per-view row dimension."""
    if tile_rows is not None:
        tm = int(tile_rows)
    else:
        tm = int(target_bytes // max(1, d * itemsize))
        tm = max(128, min(max_rows, (tm // 128) * 128))
    if tm >= n_rows:
        tm, n_pad = n_rows, n_rows                 # single full-dim tile, no padding
    else:
        tm = max(128, (tm // 128) * 128)
        if n_rows % 128 == 0:
            # prefer a multiple-of-128 divisor of n_rows -> no wrapper pad copy
            m, k = n_rows // 128, tm // 128
            while m % k:
                k -= 1
            cand = k * 128
            if cand * 4 >= tm:                     # accept unless pathologically small
                tm = cand
        n_pad = ((n_rows + tm - 1) // tm) * tm
    fw = 128 if tm % 128 == 0 else tm
    return tm, n_pad, fw


def _vmem_limit_bytes(bytes_needed):
    """Generation-aware scoped-VMEM limit: enough for this kernel, capped at ~85%
    of the physical per-core VMEM (64 MiB on v7x, 128 MiB on v5e/v6e)."""
    cap = 64 << 20
    try:
        info = pltpu.get_tpu_info()
        cap = int(getattr(info, "vmem_capacity_bytes", cap)) or cap
    except Exception:
        pass
    hi = int(cap * 0.85)
    return int(min(max(int(bytes_needed), 32 << 20), hi))


def _mi_partial_sums(glob, loc, rid, *, tm, fw):
    """glob: (2, B, D); loc: (2, N_pad, D); rid: (2, 1, N_pad) int32.
    Returns (sum of E_pos elements, sum of E_neg elements) over both views."""
    _, b, d = glob.shape
    n_pad = loc.shape[1]
    assert n_pad % tm == 0 and tm % fw == 0
    t = n_pad // tm

    isz = jnp.dtype(loc.dtype).itemsize
    est = (2 * b * d * isz            # sentence block (double buffered)
           + 2 * tm * d * isz         # local row tile (double buffered)
           + 2 * tm * 4               # rid tile
           + 4 * b * fw * 4           # two f32 accumulator output blocks
           + 8 * b * tm * 4)          # in-kernel f32 temporaries (res/sp/contribs)
    vmem_limit = _vmem_limit_bytes(est + (8 << 20))

    ep, eq = pl.pallas_call(
        _mi_jsd_kernel,
        out_shape=(jax.ShapeDtypeStruct((2, b, fw), jnp.float32),
                   jax.ShapeDtypeStruct((2, b, fw), jnp.float32)),
        grid=(2, t),
        in_specs=[
            pl.BlockSpec((None, b, d), lambda v, i: (v, 0, 0)),    # this view's sents
            pl.BlockSpec((None, tm, d), lambda v, i: (v, i, 0)),   # local row tile
            pl.BlockSpec((None, 1, tm), lambda v, i: (v, 0, i)),   # row -> sentence id
        ],
        out_specs=(
            pl.BlockSpec((None, b, fw), lambda v, i: (v, 0, 0)),   # per-view E_pos acc
            pl.BlockSpec((None, b, fw), lambda v, i: (v, 0, 0)),   # per-view E_neg acc
        ),
        compiler_params=pltpu.CompilerParams(
            # leading view axis 'parallel' -> both TensorCores on v7x megacore.
            # TODO(synk): if the dump shows no megacore split, switch this axis to
            # pltpu.CORE_PARALLEL.
            dimension_semantics=("parallel", "arbitrary"),
            vmem_limit_bytes=vmem_limit),
    )(glob, loc, rid)
    return jnp.sum(ep), jnp.sum(eq)


def mutual_information_loss(tok0, tok1, sent0, sent1, lens0, lens1, *,
                            compute_dtype=None, tile_rows=None,
                            target_tile_bytes=3 << 20):
    """Forward pass of MutualInformationLoss with objective='local', measure='JSD',
    use_head=False, use_normalize=False, args.weighted_local=False, note=' '.

    tok0, tok1:   (B, S, D) token embeddings of the two views
    sent0, sent1: (B, D)    sentence embeddings of the two views
    lens0, lens1: (B,) sentence lengths (jnp arrays or python sequences; traced, so
                  varying lengths do NOT retrigger compilation)
    compute_dtype: optional kernel-input dtype (pass jnp.bfloat16 to halve HBM
                  traffic on v5e/v6e; the matmul still accumulates in f32)
    """
    b, s, d = tok0.shape
    dtype = jnp.dtype(compute_dtype) if compute_dtype is not None else jnp.dtype(tok0.dtype)

    lens = jnp.stack([jnp.asarray(lens0, jnp.int32).reshape(b),
                      jnp.asarray(lens1, jnp.int32).reshape(b)], axis=0)
    lens = jnp.maximum(lens, 1)                               # torch.clamp(min=1)
    avg_sentence_length = jnp.mean(lens.astype(jnp.float32))  # == (mean0 + mean1) / 2

    n_v = b * s
    tm, n_pad, fw = _choose_tile(n_v, d, dtype.itemsize,
                                 tile_rows=tile_rows, target_bytes=target_tile_bytes)

    # Single contiguous materialisation of the tokens (no per-sentence gather);
    # per-view zero pad rows only when TM does not divide B*S.
    t0 = tok0.reshape(n_v, d).astype(dtype)
    t1 = tok1.reshape(n_v, d).astype(dtype)
    if n_pad > n_v:
        z = jnp.zeros((n_pad - n_v, d), dtype)
        loc = jnp.concatenate([t0, z, t1, z], axis=0).reshape(2, n_pad, d)
    else:
        loc = jnp.concatenate([t0, t1], axis=0).reshape(2, n_pad, d)

    glob = jnp.stack([sent0, sent1], axis=0).astype(dtype)    # (2, B, D)

    # row -> sentence-index vector; -1 marks padding / beyond-length rows. This
    # replaces the (N, B) pos/neg masks of the reference entirely.
    r = jnp.arange(n_pad, dtype=jnp.int32)
    sent_idx = jnp.minimum(r // s, b - 1)                     # (n_pad,)
    in_len = (r % s) < lens[:, sent_idx]                      # (2, n_pad)
    valid = in_len & (r < n_v)
    rid = jnp.where(valid, sent_idx[None, :], -1).astype(jnp.int32).reshape(2, 1, n_pad)

    ep_sum, eq_sum = _mi_partial_sums(glob, loc, rid, tm=tm, fw=fw)

    num_nodes = jnp.sum(lens).astype(jnp.float32)   # rows of the reference res matrix
    num_graphs = b                                   # columns per view (batch size)
    e_pos = ep_sum / num_nodes
    # guard: the reference divides by (num_graphs - 1) and produces inf for batch=1.
    e_neg = eq_sum / (num_nodes * max(num_graphs - 1, 1))
    loss = e_neg - e_pos
    return loss, avg_sentence_length
    # TODO(synk): weighted_local / load_weight path needs external pickle weight
    # files and per-example batch indices; not implemented (weighted_local=False).


# ---------------------------------------------------------------------------
# Pure-JAX reference of the original (un-folded) formula, for verification.
# ---------------------------------------------------------------------------
def _create_local_masks(lens):
    n = int(np.sum(lens))
    bsz = len(lens)
    pos = np.zeros((n, bsz), dtype=np.float32)
    neg = np.ones((n, bsz), dtype=np.float32)
    temp = 0
    for idx in range(bsz):
        pos[temp:temp + lens[idx], idx] = 1.0
        neg[temp:temp + lens[idx], idx] = 0.0
        temp += lens[idx]
    return jnp.asarray(pos), jnp.asarray(neg)


def _reference_loss(tok0, tok1, sent0, sent1, lens0, lens1):
    lens0 = [max(1, int(l)) for l in lens0]
    lens1 = [max(1, int(l)) for l in lens1]
    local0 = jnp.concatenate([tok0[i, :lens0[i]] for i in range(len(lens0))], 0)
    local1 = jnp.concatenate([tok1[i, :lens1[i]] for i in range(len(lens1))], 0)
    pos0, neg0 = _create_local_masks(lens0)
    pos1, neg1 = _create_local_masks(lens1)
    res = jnp.concatenate([local0 @ sent0.T, local1 @ sent1.T], 0).astype(jnp.float32)
    pos = jnp.concatenate([pos0, pos1], 0)
    neg = jnp.concatenate([neg0, neg1], 0)
    nn, bb = pos.shape
    ep = jnp.sum(-_softplus(-(res * pos)) + LOG2 * neg) / nn
    eq = jnp.sum(_softplus(-(res * neg)) + res * neg - LOG2 * pos) / (nn * (bb - 1))
    return eq - ep


if __name__ == "__main__":
    # --- test 1: small config, jitted path (single tile per view) ----------------
    B, S, D = 4, 8, 32
    key = jax.random.PRNGKey(0)
    k0, k1, k2, k3 = jax.random.split(key, 4)

    tok0 = jax.random.normal(k0, (B, S, D), dtype=jnp.float32)
    tok1 = jax.random.normal(k1, (B, S, D), dtype=jnp.float32)
    sent0 = jax.random.normal(k2, (B, D), dtype=jnp.float32)
    sent1 = jax.random.normal(k3, (B, D), dtype=jnp.float32)
    lens0 = [5, 8, 3, 7]
    lens1 = [6, 4, 8, 2]

    loss_fn = jax.jit(mutual_information_loss)
    loss, avg_len = loss_fn(tok0, tok1, sent0, sent1,
                            jnp.asarray(lens0, jnp.int32),
                            jnp.asarray(lens1, jnp.int32))
    loss = jax.block_until_ready(loss)

    ref = jax.block_until_ready(_reference_loss(tok0, tok1, sent0, sent1, lens0, lens1))
    np.testing.assert_allclose(np.asarray(loss), np.asarray(ref), rtol=1e-5, atol=1e-5)
    assert abs(float(avg_len) - (np.mean(lens0) + np.mean(lens1)) / 2.0) < 1e-5

    # --- test 2: exercises multi-tile accumulation + lane folding (TM=256, FW=128)
    B2, S2, D2 = 8, 64, 64
    k4, k5, k6, k7 = jax.random.split(jax.random.PRNGKey(1), 4)
    tok0b = jax.random.normal(k4, (B2, S2, D2), dtype=jnp.float32)
    tok1b = jax.random.normal(k5, (B2, S2, D2), dtype=jnp.float32)
    sent0b = jax.random.normal(k6, (B2, D2), dtype=jnp.float32)
    sent1b = jax.random.normal(k7, (B2, D2), dtype=jnp.float32)
    lens0b = [37, 64, 12, 55, 1, 48, 29, 60]
    lens1b = [20, 7, 64, 33, 58, 14, 41, 26]

    loss2, _ = mutual_information_loss(tok0b, tok1b, sent0b, sent1b,
                                       lens0b, lens1b, tile_rows=256)
    loss2 = jax.block_until_ready(loss2)
    ref2 = jax.block_until_ready(
        _reference_loss(tok0b, tok1b, sent0b, sent1b, lens0b, lens1b))
    np.testing.assert_allclose(np.asarray(loss2), np.asarray(ref2), rtol=1e-4, atol=1e-4)

    print("KERNEL_OK")
</pallas_src>

<mosaic_0001>
module attributes {stable_mosaic.version = 11 : i64} {
  func.func @_mi_jsd_kernel(%arg0: i32, %arg1: i32, %arg2: memref<1x4x32xf32, #tpu.memory_space<vmem>>, %arg3: memref<1x32x32xf32, #tpu.memory_space<vmem>>, %arg4: memref<1x1x32xi32, #tpu.memory_space<vmem>>, %arg5: memref<1x4x32xf32, #tpu.memory_space<vmem>>, %arg6: memref<1x4x32xf32, #tpu.memory_space<vmem>>) attributes {dimension_semantics = [#tpu.dimension_semantics<parallel>, #tpu.dimension_semantics<arbitrary>], iteration_bounds = array<i64: 2, 1>, scalar_prefetch = 0 : i64, scratch_operands = 0 : i64, tpu.core_type = #tpu.core_type<tc>, window_params = [{transform_indices = @transform_0, window_bounds = array<i64: 1, 4, 32>}, {transform_indices = @transform_1, window_bounds = array<i64: 1, 32, 32>}, {transform_indices = @transform_2, window_bounds = array<i64: 1, 1, 32>}, {transform_indices = @transform_3, window_bounds = array<i64: 1, 4, 32>}, {transform_indices = @transform_4, window_bounds = array<i64: 1, 4, 32>}]} {
    %c0_i32 = arith.constant 0 : i32
    %0 = arith.cmpi eq, %arg1, %c0_i32 : i32
    %1 = arith.extui %0 : i1 to i32
    %c0_i32_0 = arith.constant 0 : i32
    %2 = arith.cmpi ne, %1, %c0_i32_0 : i32
    scf.if %2 {
      %cst_29 = arith.constant 0.000000e+00 : f32
      %47 = vector.broadcast %cst_29 : f32 to vector<4x32xf32>
      %c0_30 = arith.constant 0 : index
      %c0_31 = arith.constant 0 : index
      %c0_32 = arith.constant 0 : index
      %48 = vector.load %arg5[%c0_30, %c0_31, %c0_32] : memref<1x4x32xf32, #tpu.memory_space<vmem>>, vector<1x4x32xf32>
      %49 = vector.shape_cast %48 : vector<1x4x32xf32> to vector<4x32xf32>
      %50 = vector.shape_cast %47 : vector<4x32xf32> to vector<1x4x32xf32>
      tpu.vector_store %arg5[%c0_30, %c0_31, %c0_32], %50 {strides = array<i32>} : memref<1x4x32xf32, #tpu.memory_space<vmem>>, vector<1x4x32xf32>,
      %cst_33 = arith.constant 0.000000e+00 : f32
      %51 = vector.broadcast %cst_33 : f32 to vector<4x32xf32>
      %c0_34 = arith.constant 0 : index
      %c0_35 = arith.constant 0 : index
      %c0_36 = arith.constant 0 : index
      %52 = vector.load %arg6[%c0_34, %c0_35, %c0_36] : memref<1x4x32xf32, #tpu.memory_space<vmem>>, vector<1x4x32xf32>
      %53 = vector.shape_cast %52 : vector<1x4x32xf32> to vector<4x32xf32>
      %54 = vector.shape_cast %51 : vector<4x32xf32> to vector<1x4x32xf32>
      tpu.vector_store %arg6[%c0_34, %c0_35, %c0_36], %54 {strides = array<i32>} : memref<1x4x32xf32, #tpu.memory_space<vmem>>, vector<1x4x32xf32>,
    } else {
    }
    %c0 = arith.constant 0 : index
    %c0_1 = arith.constant 0 : index
    %c0_2 = arith.constant 0 : index
    %3 = vector.load %arg2[%c0, %c0_1, %c0_2] : memref<1x4x32xf32, #tpu.memory_space<vmem>>, vector<1x4x32xf32>
    %4 = vector.shape_cast %3 : vector<1x4x32xf32> to vector<4x32xf32>
    %c0_3 = arith.constant 0 : index
    %c0_4 = arith.constant 0 : index
    %c0_5 = arith.constant 0 : index
    %5 = vector.load %arg3[%c0_3, %c0_4, %c0_5] : memref<1x32x32xf32, #tpu.memory_space<vmem>>, vector<1x32x32xf32>
    %6 = vector.shape_cast %5 : vector<1x32x32xf32> to vector<32x32xf32>
    %cst = arith.constant dense<0.000000e+00> : vector<4x32xf32>
    %7 = tpu.matmul %4, %6, %cst {dimension_numbers = #tpu.dot_dimension_numbers<[1], [1], [0], [0], [0, 0, 1, 0], [], []>} : vector<4x32xf32>, vector<32x32xf32>, vector<4x32xf32> -> vector<4x32xf32>
    %c0_6 = arith.constant 0 : index
    %c0_7 = arith.constant 0 : index
    %c0_8 = arith.constant 0 : index
    %8 = vector.load %arg4[%c0_6, %c0_7, %c0_8] : memref<1x1x32xi32, #tpu.memory_space<vmem>>, vector<1x1x32xi32>
    %9 = vector.shape_cast %8 : vector<1x1x32xi32> to vector<1x32xi32>
    %10 = tpu.iota {dimensions = array<i32: 0>} : vector<4x32xi32>
    %11 = vector.broadcast %9 : vector<1x32xi32> to vector<4x32xi32>
    %12 = arith.cmpi eq, %10, %11 : vector<4x32xi32>
    %c0_i32_9 = arith.constant 0 : i32
    %13 = vector.broadcast %c0_i32_9 : i32 to vector<1x32xi32>
    %14 = arith.cmpi sge, %9, %13 : vector<1x32xi32>
    %cst_10 = arith.constant dense<true> : vector<4x32xi1>
    %15 = arith.xori %12, %cst_10 : vector<4x32xi1>
    %16 = vector.broadcast %14 : vector<1x32xi1> to vector<4x32xi1>
    %17 = arith.andi %16, %15 : vector<4x32xi1>
    %cst_11 = arith.constant 0.000000e+00 : f32
    %18 = vector.broadcast %cst_11 : f32 to vector<4x32xf32>
    %19 = arith.subf %18, %7 : vector<4x32xf32>
    %cst_12 = arith.constant 0.000000e+00 : f32
    %20 = vector.broadcast %cst_12 : f32 to vector<4x32xf32>
    %21 = arith.maximumf %19, %20 : vector<4x32xf32>
    %22 = math.absf %7 : vector<4x32xf32>
    %cst_13 = arith.constant 0.000000e+00 : f32
    %23 = vector.broadcast %cst_13 : f32 to vector<4x32xf32>
    %24 = arith.subf %23, %22 : vector<4x32xf32>
    %25 = math.exp %24 : vector<4x32xf32>
    %26 = math.log1p %25 : vector<4x32xf32>
    %27 = arith.addf %21, %26 : vector<4x32xf32>
    %cst_14 = arith.constant 0.000000e+00 : f32
    %28 = vector.broadcast %cst_14 : f32 to vector<4x32xf32>
    %29 = arith.subf %28, %27 : vector<4x32xf32>
    %cst_15 = arith.constant 0.000000e+00 : f32
    %30 = vector.broadcast %cst_15 : f32 to vector<4x32xf32>
    %31 = arith.select %12, %29, %30 : vector<4x32xi1>, vector<4x32xf32>
    %32 = arith.addf %27, %7 : vector<4x32xf32>
    %cst_16 = arith.constant 0.000000e+00 : f32
    %33 = vector.broadcast %cst_16 : f32 to vector<4x32xf32>
    %34 = arith.select %17, %32, %33 : vector<4x32xi1>, vector<4x32xf32>
    %c0_17 = arith.constant 0 : index
    %c0_18 = arith.constant 0 : index
    %c0_19 = arith.constant 0 : index
    %35 = vector.load %arg5[%c0_17, %c0_18, %c0_19] : memref<1x4x32xf32, #tpu.memory_space<vmem>>, vector<1x4x32xf32>
    %36 = vector.shape_cast %35 : vector<1x4x32xf32> to vector<4x32xf32>
    %37 = arith.addf %36, %31 : vector<4x32xf32>
    %c0_20 = arith.constant 0 : index
    %c0_21 = arith.constant 0 : index
    %c0_22 = arith.constant 0 : index
    %38 = vector.load %arg5[%c0_20, %c0_21, %c0_22] : memref<1x4x32xf32, #tpu.memory_space<vmem>>, vector<1x4x32xf32>
    %39 = vector.shape_cast %38 : vector<1x4x32xf32> to vector<4x32xf32>
    %40 = vector.shape_cast %37 : vector<4x32xf32> to vector<1x4x32xf32>
    tpu.vector_store %arg5[%c0_20, %c0_21, %c0_22], %40 {strides = array<i32>} : memref<1x4x32xf32, #tpu.memory_space<vmem>>, vector<1x4x32xf32>,
    %c0_23 = arith.constant 0 : index
    %c0_24 = arith.constant 0 : index
    %c0_25 = arith.constant 0 : index
    %41 = vector.load %arg6[%c0_23, %c0_24, %c0_25] : memref<1x4x32xf32, #tpu.memory_space<vmem>>, vector<1x4x32xf32>
    %42 = vector.shape_cast %41 : vector<1x4x32xf32> to vector<4x32xf32>
    %43 = arith.addf %42, %34 : vector<4x32xf32>
    %c0_26 = arith.constant 0 : index
    %c0_27 = arith.constant 0 : index
    %c0_28 = arith.constant 0 : index
    %44 = vector.load %arg6[%c0_26, %c0_27, %c0_28] : memref<1x4x32xf32, #tpu.memory_space<vmem>>, vector<1x4x32xf32>
    %45 = vector.shape_cast %44 : vector<1x4x32xf32> to vector<4x32xf32>
    %46 = vector.shape_cast %43 : vector<4x32xf32> to vector<1x4x32xf32>
    tpu.vector_store %arg6[%c0_26, %c0_27, %c0_28], %46 {strides = array<i32>} : memref<1x4x32xf32, #tpu.memory_space<vmem>>, vector<1x4x32xf32>,
    return
  }
  func.func @transform_0(%arg0: i32, %arg1: i32) -> (i32, i32, i32) {
    %c0_i32 = arith.constant 0 : i32
    %c0_i32_0 = arith.constant 0 : i32
    %c0_i32_1 = arith.constant 0 : i32
    return %arg0, %c0_i32, %c0_i32_0 : i32, i32, i32
  }
  func.func @transform_1(%arg0: i32, %arg1: i32) -> (i32, i32, i32) {
    %c0_i32 = arith.constant 0 : i32
    %c0_i32_0 = arith.constant 0 : i32
    return %arg0, %arg1, %c0_i32 : i32, i32, i32
  }
  func.func @transform_2(%arg0: i32, %arg1: i32) -> (i32, i32, i32) {
    %c0_i32 = arith.constant 0 : i32
    %c0_i32_0 = arith.constant 0 : i32
    return %arg0, %c0_i32, %arg1 : i32, i32, i32
  }
  func.func @transform_3(%arg0: i32, %arg1: i32) -> (i32, i32, i32) {
    %c0_i32 = arith.constant 0 : i32
    %c0_i32_0 = arith.constant 0 : i32
    %c0_i32_1 = arith.constant 0 : i32
    return %arg0, %c0_i32, %c0_i32_0 : i32, i32, i32
  }
  func.func @transform_4(%arg0: i32, %arg1: i32) -> (i32, i32, i32) {
    %c0_i32 = arith.constant 0 : i32
    %c0_i32_0 = arith.constant 0 : i32
    %c0_i32_1 = arith.constant 0 : i32
    return %arg0, %c0_i32, %c0_i32_0 : i32, i32, i32
  }
}

</mosaic_0001>

<bundles_post_ra>
// kernel: mutual_information_loss.1
= control target key start
LH: loop header
LB: loop body
LE: loop exit
PB: predicated region body
PF: predicated region fallthrough
CT: control target
= control target key end

     0   :  { %s670_s15 = smov 0   ;;  %s672_s16 = smov 0   ;;  %s736_s0 = inlined_call_operand.vmem [shape: f32[2,4,32], index: 0, kind: input, shape index: {}]   ;;  %s737_s1 = inlined_call_operand.vmem [shape: f32[2,32,32], index: 1, kind: input, shape index: {}]   ;;  %s738_s2 = inlined_call_operand.vmem [shape: s32[2,1,32], index: 2, kind: input, shape index: {}]   ;;  %s739_s3 = inlined_call_operand.vmem [shape: f32[2,4,32], index: 3, kind: output, shape index: {0}]   ;;  %s740_s4 = inlined_call_operand.vmem [shape: f32[2,4,32], index: 4, kind: output, shape index: {1}]  }
   0x1   :  { %s674_s17 = smov 0  }
   0x2 LB: > { %s27_s18 = sadd.s32 1, %s634_s16  ;;  %p545_p0 = scmp.ge.s32.totalorder %s638_s17, 1  ;;  %s638_s17 = sphi %s674_s17, %s15_s17   ;;  %s634_s16 = sphi %s672_s16, %s742_s16   ;;  %s630_s15 = sphi %s670_s15, %s741_s15  }
   0x3   : > { %p29_p1 = scmp.ge.s32.totalorder %s27_s18, 2  ;;  %p206_p2 = scmp.lt.s32.totalorder %s638_s17, 3 }
   0x5   : > { %s744_s18 = smov (%p29_p1, %s27_s18), 0  ;;  %p207_p3 = pnand %p545_p0, %p206_p2 }
   0x6   : > { %p249_p4 = scmp.lt.s32.totalorder (!%p207_p3), %s630_s15, 1  ;;  %v640_v0 = vmov (!%p207_p3), 0.0|0.0   ;;  %vm641_vm0 = vmmov (!%p207_p3), 0   ;;  %v642_v1 = vmov (!%p207_p3), 0.0   ;;  %vm289_vm1 = vcmask (!%p207_p3), 261120  }
   0x7   : > { %210 = sbr.rel (%p207_p3) target bundleno = 288 (0x120), region = 32  ;;  %575 = vmatprep.subr.bf16.mxu0 (!%p207_p3), %v640_v0  ;;  %572 = vmatprep.mubr.msk.f32.mxu0 (!%p207_p3), %vm641_vm0, %v642_v1  ;;  %vm281_vm2 = vcmask (!%p207_p3), 257024   ;;  %vm577_vm3 = vmpackc.low (!%p207_p3), %vm289_vm1, %vm289_vm1  ;;  %v376_v14 = vlaneseq (!%p207_p3)  ;;  %v643_v22 = vmov (!%p207_p3), 0   ;;  %vm644_vm6 = vmmov (!%p207_p3), 1  }
   0x9   : > { %v377_v16 = vshrl.u32 (!%p207_p3), %v376_v14, 7 }
   0xb   : > { %v380_v19 = vsub.s32 (!%p207_p3), 0, %v377_v16 }
   0xe   : > { %s746_s15 = smov (!%p249_p4, %s630_s15), 1 }
   0xf   : > { %s558_s19 = sshll.u32 %s746_s15, 5  ;;  %s546_s20 = sshll.u32 %s746_s15, 2 }
  0x10   : > { %s261_s23 = scalar_lea.vmem %s737_s1, %s558_s19  ;;  %s698_s26 = scalar_lea.vmem %s739_s3, %s546_s20 }
  0x11   : > { %v285_v2 = vld [vmem:[%s261_s23] sm:$0xff]  ;;  %v286_v3 = vld [vmem:[%s261_s23 + $0x8] sm:$0xff]  ;;  %s705_s29 = scalar_lea.vmem %s740_s4, %s546_s20  ;;  %282 = vst.msk [vmem:[%s698_s26] sm:$0xf] %vm281_vm2, %v642_v1  ;;  %v287_v5 = vld [vmem:[%s261_s23 + $0x10] sm:$0xff]  ;;  %s252_s6 = scalar_lea.vmem %s736_s0, %s546_s20 }
  0x12   : > { %v576_v4 = vpack.c.bf16 %v286_v3, %v285_v2  ;;  %283 = vst.msk [vmem:[%s705_s29] sm:$0xf] %vm281_vm2, %v642_v1  ;;  %v288_v6 = vld [vmem:[%s261_s23 + $0x18] sm:$0xff]  ;;  %v284_v8 = vld [vmem:[%s252_s6] sm:$0xf]  ;;  %s268_s9 = scalar_lea.vmem %s738_s2, %s746_s15 }
  0x13   : > { %v580_v7 = vpack.c.bf16 %v288_v6, %v287_v5  ;;  %v375_v18 = vld [vmem:[%s268_s9] sm:$0x1] }
  0x14   : > { %578 = vmatpush3.bf16.xpose.msk.msra.mxu0 %vm577_vm3, %v576_v4  ;;  %vm383_vm4 = vcmp.ge.s32.totalorder %v375_v18, 0  ;;  %v381_v21 = vrot.slane %v375_v18, %v380_v19 }
  0x15   : > { %579 = vmatprep.subr.bf16.mxu0 %v640_v0  ;;  %v385_v23 = vsel %vm383_vm4, 1, %v643_v22 }
  0x16   : > { %v389_v25 = vrot.slane %v385_v23, %v380_v19  ;;  %vm382_vm5 = vcmp.eq.s32.totalorder %v377_v16, %v381_v21 }
  0x17   : > { %vm384_vm7 = vmxor %vm382_vm5, %vm644_vm6 }
  0x18   : > { %vm390_vm8 = vcmp.eq.s32.totalorder %v389_v25, 1  ;;  %v412_v34 = vld [vmem:[%s698_s26] sm:$0xf] }
  0x19   : > { %vm391_vm10 = vmand %vm390_vm8, %vm384_vm7  ;;  %v416_v37 = vld [vmem:[%s705_s29] sm:$0xf] }
  0x1c   : > { %582 = vmatpush3.bf16.xpose.msk.msra.mxu0 %vm577_vm3, %v580_v7 }
  0x23   : > { %573 = vmatmul.mubr.msk.f32.vlgmr.msra.gmra.mrb[0].mxu0 %vm289_vm1, %v284_v8 }
  0xf6   : > { %v371_v9 = vpop.f32.mrb[0].mxu0 }
  0xf7   : > { %v394_v10 = vand.u32 2147483647, %v371_v9  ;;  %v574_v11 = vpop.f32.mrb[1].mxu0  ;;  %v392_v26 = vsub.f32 0.0, %v371_v9 }
  0xf9   : > { %v395_v12 = vsub.f32 0.0, %v394_v10  ;;  %v393_v31 = vmax.f32 %v392_v26, 0.0 }
  0xfb   : > { %v396_v13 = vmul.f32 1.442695, %v395_v12 }
  0xfd   : > { %612 = vpow2.f32 %v396_v13 }
 0x107   : > { %v613_v15 = vpop.eup %612 }
 0x108   : > { %v398_v17 = vadd.f32 1.0, %v613_v15  ;;  %v401_v20 = vmul.f32 -0.5, %v613_v15  ;;  %v404_v27 = vand.u32 2147483647, %v613_v15 }
 0x10a   : > { %614 = vlog2.f32 %v398_v17  ;;  %v402_v24 = vadd.f32 1.0, %v401_v20  ;;  %vm405_vm9 = vcmp.lt.f32.partialorder %v404_v27, 0.0004427343 }
 0x10c   : > { %v403_v30 = vmul.f32 %v613_v15, %v402_v24 }
 0x114   : > { %v615_v28 = vpop.eup %614 }
 0x115   : > { %v400_v29 = vmul.f32 0.6931472, %v615_v28 }
 0x117   : > { %v406_v32 = vsel %vm405_vm9, %v403_v30, %v400_v29 }
 0x118   : > { %v407_v33 = vadd.f32 %v406_v32, %v393_v31 }
 0x11a   : > { %v408_v35 = vsub.f32 0.0, %v407_v33  ;;  %v410_v36 = vadd.f32 %v407_v33, %v371_v9 }
 0x11c   : > { %v409_v38 = vsel %vm382_vm5, %v408_v35, 0.0  ;;  %v411_v39 = vsel %vm391_vm10, %v410_v36, 0.0 }
 0x11d   : > { %v413_v40 = vadd.f32 %v412_v34, %v409_v38  ;;  %v417_v41 = vadd.f32 %v416_v37, %v411_v39 }
 0x11f   : > { %415 = vst.msk [vmem:[%s698_s26] sm:$0xf] %vm281_vm2, %v413_v40  ;;  %418 = vst.msk [vmem:[%s705_s29] sm:$0xf] %vm281_vm2, %v417_v41 }
 0x120 PF: > { %s15_s17 = sadd.s32 1, %s638_s17   ;;  %s741_s15 = smov %s634_s16 }
 0x121   : > { %p12_p5 = scmp.ge.s32.totalorder %s15_s17, 4   ;;  %s742_s16 = smov %s744_s18 }
 0x123   :  { %14 = sbr.rel (!%p12_p5) target bundleno = 2 (0x2), region = 84 }

</bundles_post_ra>
